<compile_context>
chip_gen: v7x
topology: tpu7x:2x2x1
jax: 0.10.0
libtpu: 0.0.40
codegen_flags: <defaults>
</compile_context>

<pallas_src>
import math

import jax
import jax.numpy as jnp
import numpy as np
from jax.experimental import pallas as pl
from jax.experimental.pallas import tpu as pltpu


def make_weights(seq_length: int, sigma_faktor: int) -> np.ndarray:
    """Deterministic weight vector, identical math to the torch __init__ (scipy-free)."""
    sigma = seq_length / sigma_faktor
    x = np.linspace(1, seq_length, seq_length).astype(np.float64)
    mu = float(seq_length)
    y = np.exp(-0.5 * ((x - mu) / sigma) ** 2) / (sigma * math.sqrt(2.0 * math.pi))
    y = y + np.max(y) / 15.0
    y = y / np.sum(y) * seq_length
    return y.astype(np.float32)


def _wmse_kernel(pred_ref, target_ref, w_ref, out_ref):
    """One step: weighted squared error of a (g_tile, 32, L) slab, reduced over
    the leading axis into the per-core resident (1, 32, L) f32 accumulator."""
    i = pl.program_id(1)  # inner ("arbitrary") accumulation axis

    @pl.when(i == 0)
    def _():
        out_ref[...] = jnp.zeros_like(out_ref)

    p = pred_ref[...].astype(jnp.float32)       # cast under the DMA (free on VPU)
    t = target_ref[...].astype(jnp.float32)
    d = p - t
    weighted = d * d * w_ref[...]               # (g_tile, 32, L) * (1, 32, L)
    out_ref[...] += jnp.sum(weighted, axis=0, keepdims=True)   # pure VPU adds


def weighted_mse_loss(pred: jax.Array, target: jax.Array, weights: jax.Array,
                      *, vmem_budget_bytes: int = 8 * 1024 * 1024) -> jax.Array:
    """pred/target: (B, S) float; weights: (S,) float. Returns scalar f32 loss."""
    B, S = pred.shape
    assert target.shape == (B, S)
    assert weights.shape == (S,)

    SUB = 32                                    # sublanes per group (ok for f32/bf16/i8 tiling)
    L = (S * 128) // math.gcd(S, 128)           # lcm(S, 128): lane-dense row width
    pack = L // S
    group_elems = SUB * L

    N = B * S
    g_total = -(-N // group_elems)              # ceil

    itemsize = jnp.dtype(pred.dtype).itemsize
    # 2 inputs x 2 pipeline buffers of one (g_tile, SUB, L) slab each must fit the budget.
    g_tile_max = max(1, vmem_budget_bytes // (4 * group_elems * itemsize))

    if g_total <= g_tile_max:
        ncores, n_inner, g_tile = 1, 1, g_total
    else:
        ncores = 2                              # megacore split (v7x); serialized on 1-TC chips
        n_inner = -(-g_total // (ncores * g_tile_max))
        g_tile = -(-g_total // (ncores * n_inner))
    g_pad = ncores * n_inner * g_tile

    # Zero-pad the flattened streams to a whole number of tiles; padded elements
    # contribute (0 - 0)^2 * w = 0 and the mean divides by the true N.
    pad = g_pad * group_elems - N
    flat_p = pred.reshape(-1)
    flat_t = target.reshape(-1)
    if pad:
        flat_p = jnp.pad(flat_p, (0, pad))
        flat_t = jnp.pad(flat_t, (0, pad))
    p3 = flat_p.reshape(g_pad, SUB, L)
    t3 = flat_t.reshape(g_pad, SUB, L)

    # Flat element n has weight weights[n % S]; since L % S == 0, every lane row of
    # length L sees the weight vector tiled `pack` times (same for every row).
    w_row = jnp.tile(weights.astype(jnp.float32), pack)        # (L,)
    w3 = jnp.tile(w_row.reshape(1, 1, L), (1, SUB, 1))          # (1, SUB, L)

    def in_map(c, i):
        return (c * n_inner + i, 0, 0)

    partials = pl.pallas_call(
        _wmse_kernel,
        out_shape=jax.ShapeDtypeStruct((ncores, SUB, L), jnp.float32),
        grid=(ncores, n_inner),
        in_specs=[
            pl.BlockSpec((g_tile, SUB, L), in_map),
            pl.BlockSpec((g_tile, SUB, L), in_map),
            pl.BlockSpec((1, SUB, L), lambda c, i: (0, 0, 0)),
        ],
        out_specs=pl.BlockSpec((1, SUB, L), lambda c, i: (c, 0, 0)),
        compiler_params=pltpu.CompilerParams(
            dimension_semantics=("parallel", "arbitrary"),
        ),
    )(p3, t3, w3)

    # Tiny final reduction (ncores*32*L elements) done in XLA.
    return jnp.sum(partials) / jnp.float32(N)


if __name__ == "__main__":
    SEQ_LENGTH = 40       # module default
    SIGMA_FAKTOR = 10     # module default
    B = 64                # small demo batch

    weights = jnp.asarray(make_weights(SEQ_LENGTH, SIGMA_FAKTOR))

    key = jax.random.PRNGKey(0)
    kp, kt = jax.random.split(key)
    pred = jax.random.normal(kp, (B, SEQ_LENGTH), dtype=jnp.float32)
    target = jax.random.normal(kt, (B, SEQ_LENGTH), dtype=jnp.float32)

    loss = jax.block_until_ready(weighted_mse_loss(pred, target, weights))
    ref = jnp.mean((pred - target) ** 2 * weights[None, :])
    assert jnp.allclose(loss, ref, rtol=1e-5, atol=1e-6), (loss, ref)

    # Also exercise the multi-tile / two-core accumulation path with bf16 inputs
    # (a tiny VMEM budget forces grid=(2, n_inner) with several steps per core).
    B2 = 4096
    kp2, kt2 = jax.random.split(jax.random.PRNGKey(1))
    pred2 = jax.random.normal(kp2, (B2, SEQ_LENGTH), dtype=jnp.bfloat16)
    target2 = jax.random.normal(kt2, (B2, SEQ_LENGTH), dtype=jnp.bfloat16)
    loss2 = jax.block_until_ready(
        weighted_mse_loss(pred2, target2, weights, vmem_budget_bytes=512 * 1024))
    ref2 = jnp.mean(
        (pred2.astype(jnp.float32) - target2.astype(jnp.float32)) ** 2
        * weights[None, :])
    assert jnp.allclose(loss2, ref2, rtol=1e-4, atol=1e-5), (loss2, ref2)

    print("KERNEL_OK")
</pallas_src>

<mosaic_0001>
module attributes {stable_mosaic.version = 11 : i64} {
  func.func @_wmse_kernel(%arg0: i32, %arg1: i32, %arg2: memref<1x32x640xf32, #tpu.memory_space<vmem>>, %arg3: memref<1x32x640xf32, #tpu.memory_space<vmem>>, %arg4: memref<1x32x640xf32, #tpu.memory_space<vmem>>, %arg5: memref<1x32x640xf32, #tpu.memory_space<vmem>>) attributes {dimension_semantics = [#tpu.dimension_semantics<parallel>, #tpu.dimension_semantics<arbitrary>], iteration_bounds = array<i64: 1, 1>, scalar_prefetch = 0 : i64, scratch_operands = 0 : i64, tpu.core_type = #tpu.core_type<tc>, window_params = [{transform_indices = @transform_0, window_bounds = array<i64: 1, 32, 640>}, {transform_indices = @transform_1, window_bounds = array<i64: 1, 32, 640>}, {pipeline_mode = #tpu.pipeline_mode<synchronous>, transform_indices = @transform_2, window_bounds = array<i64: 1, 32, 640>}, {transform_indices = @transform_3, window_bounds = array<i64: 1, 32, 640>}]} {
    %c0_i32 = arith.constant 0 : i32
    %0 = arith.cmpi eq, %arg1, %c0_i32 : i32
    %1 = arith.extui %0 : i1 to i32
    %c0_i32_0 = arith.constant 0 : i32
    %2 = arith.cmpi ne, %1, %c0_i32_0 : i32
    scf.if %2 {
      %cst_15 = arith.constant 0.000000e+00 : f32
      %14 = vector.broadcast %cst_15 : f32 to vector<1x32x640xf32>
      %c0_16 = arith.constant 0 : index
      %c0_17 = arith.constant 0 : index
      %c0_18 = arith.constant 0 : index
      %15 = vector.load %arg5[%c0_16, %c0_17, %c0_18] : memref<1x32x640xf32, #tpu.memory_space<vmem>>, vector<1x32x640xf32>
      tpu.vector_store %arg5[%c0_16, %c0_17, %c0_18], %14 {strides = array<i32>} : memref<1x32x640xf32, #tpu.memory_space<vmem>>, vector<1x32x640xf32>,
    } else {
    }
    %c0 = arith.constant 0 : index
    %c0_1 = arith.constant 0 : index
    %c0_2 = arith.constant 0 : index
    %3 = vector.load %arg2[%c0, %c0_1, %c0_2] : memref<1x32x640xf32, #tpu.memory_space<vmem>>, vector<1x32x640xf32>
    %c0_3 = arith.constant 0 : index
    %c0_4 = arith.constant 0 : index
    %c0_5 = arith.constant 0 : index
    %4 = vector.load %arg3[%c0_3, %c0_4, %c0_5] : memref<1x32x640xf32, #tpu.memory_space<vmem>>, vector<1x32x640xf32>
    %5 = arith.subf %3, %4 : vector<1x32x640xf32>
    %6 = arith.mulf %5, %5 : vector<1x32x640xf32>
    %c0_6 = arith.constant 0 : index
    %c0_7 = arith.constant 0 : index
    %c0_8 = arith.constant 0 : index
    %7 = vector.load %arg4[%c0_6, %c0_7, %c0_8] : memref<1x32x640xf32, #tpu.memory_space<vmem>>, vector<1x32x640xf32>
    %8 = arith.mulf %6, %7 : vector<1x32x640xf32>
    %c0_9 = arith.constant 0 : index
    %c0_10 = arith.constant 0 : index
    %c0_11 = arith.constant 0 : index
    %9 = vector.load %arg5[%c0_9, %c0_10, %c0_11] : memref<1x32x640xf32, #tpu.memory_space<vmem>>, vector<1x32x640xf32>
    %cst = arith.constant dense<0.000000e+00> : vector<32x640xf32>
    %10 = vector.multi_reduction <add>, %8, %cst [0] : vector<1x32x640xf32> to vector<32x640xf32>
    %11 = vector.shape_cast %10 : vector<32x640xf32> to vector<1x32x640xf32>
    %12 = arith.addf %9, %11 : vector<1x32x640xf32>
    %c0_12 = arith.constant 0 : index
    %c0_13 = arith.constant 0 : index
    %c0_14 = arith.constant 0 : index
    %13 = vector.load %arg5[%c0_12, %c0_13, %c0_14] : memref<1x32x640xf32, #tpu.memory_space<vmem>>, vector<1x32x640xf32>
    tpu.vector_store %arg5[%c0_12, %c0_13, %c0_14], %12 {strides = array<i32>} : memref<1x32x640xf32, #tpu.memory_space<vmem>>, vector<1x32x640xf32>,
    return
  }
  func.func @transform_0(%arg0: i32, %arg1: i32) -> (i32, i32, i32) {
    %c1_i32 = arith.constant 1 : i32
    %0 = arith.muli %arg0, %c1_i32 : i32
    %1 = arith.addi %0, %arg1 : i32
    %c0_i32 = arith.constant 0 : i32
    %c0_i32_0 = arith.constant 0 : i32
    %c0_i32_1 = arith.constant 0 : i32
    return %1, %c0_i32, %c0_i32_0 : i32, i32, i32
  }
  func.func @transform_1(%arg0: i32, %arg1: i32) -> (i32, i32, i32) {
    %c1_i32 = arith.constant 1 : i32
    %0 = arith.muli %arg0, %c1_i32 : i32
    %1 = arith.addi %0, %arg1 : i32
    %c0_i32 = arith.constant 0 : i32
    %c0_i32_0 = arith.constant 0 : i32
    %c0_i32_1 = arith.constant 0 : i32
    return %1, %c0_i32, %c0_i32_0 : i32, i32, i32
  }
  func.func @transform_2(%arg0: i32, %arg1: i32) -> (i32, i32, i32) {
    %c0_i32 = arith.constant 0 : i32
    %c0_i32_0 = arith.constant 0 : i32
    %c0_i32_1 = arith.constant 0 : i32
    %c0_i32_2 = arith.constant 0 : i32
    return %c0_i32, %c0_i32_0, %c0_i32_1 : i32, i32, i32
  }
  func.func @transform_3(%arg0: i32, %arg1: i32) -> (i32, i32, i32) {
    %c0_i32 = arith.constant 0 : i32
    %c0_i32_0 = arith.constant 0 : i32
    %c0_i32_1 = arith.constant 0 : i32
    return %arg0, %c0_i32, %c0_i32_0 : i32, i32, i32
  }
}

</mosaic_0001>

<bundles_post_ra>
// kernel: tpu_custom_call.1
= control target key start
LH: loop header
LB: loop body
LE: loop exit
PB: predicated region body
PF: predicated region fallthrough
CT: control target
= control target key end

     0   :  { %8 = vsyncpa [#allocation3], 0  ;;  %s502_s0 = inlined_call_operand.hbm [shape: f32[1,32,640], index: 0, kind: input, shape index: {}]   ;;  %s503_s1 = inlined_call_operand.hbm [shape: f32[1,32,640], index: 1, kind: input, shape index: {}]   ;;  %s504_s2 = inlined_call_operand.hbm [shape: f32[1,32,640], index: 2, kind: input, shape index: {}]   ;;  %s505_s3 = inlined_call_operand.hbm [shape: f32[1,32,640], index: 3, kind: output, shape index: {}]  }
   0x1   :  { %9 = vsyncpa [#allocation6], 0 }
   0x2   :  { %10 = vsyncpa [#allocation4], 0  ;;  %s409_s12 = smov [#allocation5]   ;;  %s410_s14 = smov [#allocation2]  }
   0x3   :  { %s36_s13 = sshll.u32 %s409_s12, 4  ;;  %s20_s15 = sshll.u32 %s410_s14, 4  ;;  %s37_s13 = int_to_ptr.vmem [resolvable:$true] %s36_s13  ;;  %s435_s15 = int_to_ptr.vmem [resolvable:$true] %s20_s15 }
   0x4   :  { %s315_s18 = scalar_lea.hbm %s503_s1, 2560 }
   0x5   :  { %p316_p0 = scmp.ne.s32.totalorder %s503_s1, %s315_s18  ;;  %p319_p1 = scmp.lt.u32.totalorder %s315_s18, %s503_s1 }
   0x7   :  { %p321_p2 = pnand %p319_p1, %p316_p0 }
   0x9   :  { %324 = shalt.err (!%p321_p2)
}
   0xa   :  { %s325_s23 = scalar_lea.vmem %s37_s13, 2560  ;;  %p330_p4 = scmp.lt.s32.totalorder %s37_s13, %s37_s13 }
   0xb   :  { %p326_p3 = scmp.ne.s32.totalorder %s37_s13, %s325_s23  ;;  %p331_p5 = scmp.lt.s32.totalorder %s325_s23, %s325_s23 }
   0xd   :  { %p332_p6 = por %p331_p5, %p330_p4 }
   0xf   :  { %p333_p7 = pnand %p332_p6, %p326_p3 }
  0x11   :  { %336 = shalt.err (!%p333_p7)
}
  0x12   :  { %s411_s24 = smov 640   ;;  %s412_s25 = smov 40  }
  0x13   :  { %42 = dma.hbm_to_vmem [thread:$0]  %s503_s1, 2560, %s37_s13, [#allocation6], %s411_s24, %s411_s24, %s412_s25  }
  0x14   :  { %s337_s30 = scalar_lea.hbm %s502_s0, 2560 }
  0x15   :  { %p338_p8 = scmp.ne.s32.totalorder %s502_s0, %s337_s30  ;;  %p341_p9 = scmp.lt.u32.totalorder %s337_s30, %s502_s0 }
  0x17   :  { %p343_p10 = pnand %p341_p9, %p338_p8 }
  0x19   :  { %346 = shalt.err (!%p343_p10)
}
  0x1a   :  { %s347_s8 = scalar_lea.vmem %s435_s15, 2560  ;;  %p352_p12 = scmp.lt.s32.totalorder %s435_s15, %s435_s15 }
  0x1b   :  { %p348_p11 = scmp.ne.s32.totalorder %s435_s15, %s347_s8  ;;  %p353_p13 = scmp.lt.s32.totalorder %s347_s8, %s347_s8 }
  0x1d   :  { %p354_p0 = por %p353_p13, %p352_p12 }
  0x1f   :  { %p355_p1 = pnand %p354_p0, %p348_p11 }
  0x21   :  { %358 = shalt.err (!%p355_p1)
}
  0x22   :  { %26 = dma.hbm_to_vmem [thread:$0]  %s502_s0, 2560, %s435_s15, [#allocation3], %s411_s24, %s411_s24, %s412_s25  }
  0x23   :  { %s413_s10 = smov [#allocation7]   ;;  %s359_s14 = scalar_lea.hbm %s504_s2, 2560 }
  0x24   :  { %s48_s11 = sshll.u32 %s413_s10, 4  ;;  %p360_p2 = scmp.ne.s32.totalorder %s504_s2, %s359_s14  ;;  %s49_s11 = int_to_ptr.vmem [resolvable:$true] %s48_s11 }
  0x25   :  { %p363_p3 = scmp.lt.u32.totalorder %s359_s14, %s504_s2 }
  0x27   :  { %p365_p4 = pnand %p363_p3, %p360_p2 }
  0x29   :  { %368 = shalt.err (!%p365_p4)
}
  0x2a   :  { %s369_s20 = scalar_lea.vmem %s49_s11, 2560  ;;  %p374_p6 = scmp.lt.s32.totalorder %s49_s11, %s49_s11 }
  0x2b   :  { %p370_p5 = scmp.ne.s32.totalorder %s49_s11, %s369_s20  ;;  %p375_p7 = scmp.lt.s32.totalorder %s369_s20, %s369_s20 }
  0x2d   :  { %p376_p8 = por %p375_p7, %p374_p6 }
  0x2f   :  { %p377_p9 = pnand %p376_p8, %p370_p5 }
  0x31   :  { %380 = shalt.err (!%p377_p9)
}
  0x32   :  { %54 = dma.hbm_to_vmem [thread:$0]  %s504_s2, 2560, %s49_s11, [#allocation6], %s411_s24, %s411_s24, %s412_s25  }
  0x33   :  { %403 = dma.done.wait [#allocation3], 2560  }
  0x34   :  { %404 = vsyncadd [#allocation3], 4294964736 }
  0x35   :  { %405 = dma.done.wait [#allocation6], 5120  }
  0x36   :  { %406 = vsyncadd [#allocation6], 4294962176  ;;  %v90_v0 = vld [vmem:[#allocation2] sm:$0xff]  ;;  %v91_v3 = vld [vmem:[#allocation2 + $0x8] sm:$0xff]  ;;  %s414_s2 = smov [#allocation8]  }
  0x37   :  { %v110_v1 = vld [vmem:[#allocation5] sm:$0xff]  ;;  %v111_v4 = vld [vmem:[#allocation5 + $0x8] sm:$0xff]  ;;  %v92_v7 = vld [vmem:[#allocation2 + $0x10] sm:$0xff]  ;;  %s295_s21 = sshll.u32 %s414_s2, 4  ;;  %s296_s21 = int_to_ptr.vmem [resolvable:$true] %s295_s21 }
  0x38   :  { %v130_v2 = vsub.f32 %v90_v0, %v110_v1  ;;  %v170_v5 = vld [vmem:[#allocation7] sm:$0xff]  ;;  %v131_v6 = vsub.f32 %v91_v3, %v111_v4  ;;  %v112_v8 = vld [vmem:[#allocation5 + $0x10] sm:$0xff]  ;;  %v171_v10 = vld [vmem:[#allocation7 + $0x8] sm:$0xff]  ;;  %s381_s22 = scalar_lea.vmem %s296_s21, 2560  ;;  %p386_p11 = scmp.lt.s32.totalorder %s296_s21, %s296_s21 }
  0x39   :  { %v132_v11 = vsub.f32 %v92_v7, %v112_v8  ;;  %v93_v12 = vld [vmem:[#allocation2 + $0x18] sm:$0xff]  ;;  %v172_v15 = vld [vmem:[#allocation7 + $0x10] sm:$0xff]  ;;  %v94_v17 = vld [vmem:[#allocation2 + $0x20] sm:$0xff]  ;;  %p382_p10 = scmp.ne.s32.totalorder %s296_s21, %s381_s22  ;;  %p387_p12 = scmp.lt.s32.totalorder %s381_s22, %s381_s22 }
  0x3a   :  { %v150_v9 = vmul.f32 %v130_v2, %v130_v2  ;;  %v113_v13 = vld [vmem:[#allocation5 + $0x18] sm:$0xff]  ;;  %v151_v14 = vmul.f32 %v131_v6, %v131_v6  ;;  %v114_v18 = vld [vmem:[#allocation5 + $0x20] sm:$0xff]  ;;  %v95_v23 = vld [vmem:[#allocation2 + $0x28] sm:$0xff] }
  0x3b   :  { %v133_v16 = vsub.f32 %v93_v12, %v113_v13  ;;  %v152_v20 = vmul.f32 %v132_v11, %v132_v11  ;;  %v173_v21 = vld [vmem:[#allocation7 + $0x18] sm:$0xff]  ;;  %v134_v22 = vsub.f32 %v94_v17, %v114_v18  ;;  %v115_v24 = vld [vmem:[#allocation5 + $0x28] sm:$0xff]  ;;  %v174_v27 = vld [vmem:[#allocation7 + $0x20] sm:$0xff]  ;;  %p388_p13 = por %p387_p12, %p386_p11 }
  0x3c   :  { %v190_v19 = vmul.f32 %v170_v5, %v150_v9  ;;  %v191_v25 = vmul.f32 %v171_v10, %v151_v14  ;;  %v135_v28 = vsub.f32 %v95_v23, %v115_v24  ;;  %v96_v29 = vld [vmem:[#allocation2 + $0x30] sm:$0xff]  ;;  %v175_v33 = vld [vmem:[#allocation7 + $0x28] sm:$0xff]  ;;  %v97_v35 = vld [vmem:[#allocation2 + $0x38] sm:$0xff] }
  0x3d   :  { %v153_v26 = vmul.f32 %v133_v16, %v133_v16  ;;  %v116_v30 = vld [vmem:[#allocation5 + $0x30] sm:$0xff]  ;;  %v192_v31 = vmul.f32 %v172_v15, %v152_v20  ;;  %v154_v32 = vmul.f32 %v134_v22, %v134_v22  ;;  %v117_v36 = vld [vmem:[#allocation5 + $0x38] sm:$0xff]  ;;  %v98_v41 = vld [vmem:[#allocation2 + $0x40] sm:$0xff]  ;;  %p389_p0 = pnand %p388_p13, %p382_p10 }
  0x3e   :  { %v136_v34 = vsub.f32 %v96_v29, %v116_v30  ;;  %v155_v38 = vmul.f32 %v135_v28, %v135_v28  ;;  %v176_v39 = vld [vmem:[#allocation7 + $0x30] sm:$0xff]  ;;  %v137_v40 = vsub.f32 %v97_v35, %v117_v36  ;;  %v118_v42 = vld [vmem:[#allocation5 + $0x40] sm:$0xff]  ;;  %270 = vst [vmem:[#allocation8] sm:$0xff] %v190_v19  ;;  %v177_v45 = vld [vmem:[#allocation7 + $0x38] sm:$0xff] }
  0x3f   :  { %v193_v37 = vmul.f32 %v173_v21, %v153_v26  ;;  %v194_v43 = vmul.f32 %v174_v27, %v154_v32  ;;  %v138_v46 = vsub.f32 %v98_v41, %v118_v42  ;;  %v99_v47 = vld [vmem:[#allocation2 + $0x48] sm:$0xff]  ;;  %271 = vst [vmem:[#allocation8 + $0x8] sm:$0xff] %v191_v25  ;;  %v178_v51 = vld [vmem:[#allocation7 + $0x40] sm:$0xff]  ;;  %v100_v53 = vld [vmem:[#allocation2 + $0x50] sm:$0xff] }
  0x40   :  { %v156_v44 = vmul.f32 %v136_v34, %v136_v34  ;;  %v119_v48 = vld [vmem:[#allocation5 + $0x48] sm:$0xff]  ;;  %v195_v49 = vmul.f32 %v175_v33, %v155_v38  ;;  %v157_v50 = vmul.f32 %v137_v40, %v137_v40  ;;  %v120_v54 = vld [vmem:[#allocation5 + $0x50] sm:$0xff]  ;;  %272 = vst [vmem:[#allocation8 + $0x10] sm:$0xff] %v192_v31  ;;  %v101_v59 = vld [vmem:[#allocation2 + $0x58] sm:$0xff] }
  0x41   :  { %v139_v52 = vsub.f32 %v99_v47, %v119_v48  ;;  %v158_v56 = vmul.f32 %v138_v46, %v138_v46  ;;  %v179_v57 = vld [vmem:[#allocation7 + $0x48] sm:$0xff]  ;;  %v140_v58 = vsub.f32 %v100_v53, %v120_v54  ;;  %v121_v60 = vld [vmem:[#allocation5 + $0x58] sm:$0xff]  ;;  %273 = vst [vmem:[#allocation8 + $0x18] sm:$0xff] %v193_v37  ;;  %v180_v63 = vld [vmem:[#allocation7 + $0x50] sm:$0xff] }
  0x42   :  { %v196_v55 = vmul.f32 %v176_v39, %v156_v44  ;;  %v197_v61 = vmul.f32 %v177_v45, %v157_v50  ;;  %v141_v0 = vsub.f32 %v101_v59, %v121_v60  ;;  %v102_v1 = vld [vmem:[#allocation2 + $0x60] sm:$0xff]  ;;  %274 = vst [vmem:[#allocation8 + $0x20] sm:$0xff] %v194_v43  ;;  %v181_v5 = vld [vmem:[#allocation7 + $0x58] sm:$0xff]  ;;  %v103_v7 = vld [vmem:[#allocation2 + $0x68] sm:$0xff] }
  0x43   :  { %v159_v62 = vmul.f32 %v139_v52, %v139_v52  ;;  %v122_v2 = vld [vmem:[#allocation5 + $0x60] sm:$0xff]  ;;  %v198_v3 = vmul.f32 %v178_v51, %v158_v56  ;;  %v160_v4 = vmul.f32 %v140_v58, %v140_v58  ;;  %v123_v8 = vld [vmem:[#allocation5 + $0x68] sm:$0xff]  ;;  %275 = vst [vmem:[#allocation8 + $0x28] sm:$0xff] %v195_v49  ;;  %v104_v13 = vld [vmem:[#allocation2 + $0x70] sm:$0xff] }
  0x44   :  { %v142_v6 = vsub.f32 %v102_v1, %v122_v2  ;;  %v161_v10 = vmul.f32 %v141_v0, %v141_v0  ;;  %v182_v11 = vld [vmem:[#allocation7 + $0x60] sm:$0xff]  ;;  %v143_v12 = vsub.f32 %v103_v7, %v123_v8  ;;  %v124_v14 = vld [vmem:[#allocation5 + $0x70] sm:$0xff]  ;;  %276 = vst [vmem:[#allocation8 + $0x30] sm:$0xff] %v196_v55  ;;  %v183_v17 = vld [vmem:[#allocation7 + $0x68] sm:$0xff] }
  0x45   :  { %v199_v9 = vmul.f32 %v179_v57, %v159_v62  ;;  %v200_v15 = vmul.f32 %v180_v63, %v160_v4  ;;  %v144_v18 = vsub.f32 %v104_v13, %v124_v14  ;;  %v105_v19 = vld [vmem:[#allocation2 + $0x78] sm:$0xff]  ;;  %277 = vst [vmem:[#allocation8 + $0x38] sm:$0xff] %v197_v61  ;;  %v184_v23 = vld [vmem:[#allocation7 + $0x70] sm:$0xff]  ;;  %v106_v25 = vld [vmem:[#allocation2 + $0x80] sm:$0xff] }
  0x46   :  { %v162_v16 = vmul.f32 %v142_v6, %v142_v6  ;;  %v125_v20 = vld [vmem:[#allocation5 + $0x78] sm:$0xff]  ;;  %v201_v21 = vmul.f32 %v181_v5, %v161_v10  ;;  %v163_v22 = vmul.f32 %v143_v12, %v143_v12  ;;  %v126_v26 = vld [vmem:[#allocation5 + $0x80] sm:$0xff]  ;;  %278 = vst [vmem:[#allocation8 + $0x40] sm:$0xff] %v198_v3  ;;  %v107_v31 = vld [vmem:[#allocation2 + $0x88] sm:$0xff] }
  0x47   :  { %v145_v24 = vsub.f32 %v105_v19, %v125_v20  ;;  %v164_v28 = vmul.f32 %v144_v18, %v144_v18  ;;  %v185_v29 = vld [vmem:[#allocation7 + $0x78] sm:$0xff]  ;;  %v146_v30 = vsub.f32 %v106_v25, %v126_v26  ;;  %v127_v32 = vld [vmem:[#allocation5 + $0x88] sm:$0xff]  ;;  %279 = vst [vmem:[#allocation8 + $0x48] sm:$0xff] %v199_v9  ;;  %v186_v35 = vld [vmem:[#allocation7 + $0x80] sm:$0xff] }
  0x48   :  { %v202_v27 = vmul.f32 %v182_v11, %v162_v16  ;;  %v203_v33 = vmul.f32 %v183_v17, %v163_v22  ;;  %v147_v36 = vsub.f32 %v107_v31, %v127_v32  ;;  %v108_v37 = vld [vmem:[#allocation2 + $0x90] sm:$0xff]  ;;  %280 = vst [vmem:[#allocation8 + $0x50] sm:$0xff] %v200_v15  ;;  %v187_v41 = vld [vmem:[#allocation7 + $0x88] sm:$0xff]  ;;  %v109_v43 = vld [vmem:[#allocation2 + $0x98] sm:$0xff] }
  0x49   :  { %v165_v34 = vmul.f32 %v145_v24, %v145_v24  ;;  %v128_v38 = vld [vmem:[#allocation5 + $0x90] sm:$0xff]  ;;  %v204_v39 = vmul.f32 %v184_v23, %v164_v28  ;;  %v166_v40 = vmul.f32 %v146_v30, %v146_v30  ;;  %v129_v44 = vld [vmem:[#allocation5 + $0x98] sm:$0xff]  ;;  %281 = vst [vmem:[#allocation8 + $0x58] sm:$0xff] %v201_v21 }
  0x4a   :  { %v148_v42 = vsub.f32 %v108_v37, %v128_v38  ;;  %v167_v46 = vmul.f32 %v147_v36, %v147_v36  ;;  %v188_v47 = vld [vmem:[#allocation7 + $0x90] sm:$0xff]  ;;  %v149_v48 = vsub.f32 %v109_v43, %v129_v44  ;;  %282 = vst [vmem:[#allocation8 + $0x60] sm:$0xff] %v202_v27  ;;  %v189_v51 = vld [vmem:[#allocation7 + $0x98] sm:$0xff]  ;;  %283 = vst [vmem:[#allocation8 + $0x68] sm:$0xff] %v203_v33 }
  0x4b   :  { %v205_v45 = vmul.f32 %v185_v29, %v165_v34  ;;  %v206_v49 = vmul.f32 %v186_v35, %v166_v40  ;;  %284 = vst [vmem:[#allocation8 + $0x70] sm:$0xff] %v204_v39 }
  0x4c   :  { %v168_v50 = vmul.f32 %v148_v42, %v148_v42  ;;  %v207_v52 = vmul.f32 %v187_v41, %v167_v46  ;;  %v169_v53 = vmul.f32 %v149_v48, %v149_v48 }
  0x4d   :  { %285 = vst [vmem:[#allocation8 + $0x78] sm:$0xff] %v205_v45  ;;  %286 = vst [vmem:[#allocation8 + $0x80] sm:$0xff] %v206_v49 }
  0x4e   :  { %v208_v54 = vmul.f32 %v188_v47, %v168_v50  ;;  %v209_v55 = vmul.f32 %v189_v51, %v169_v53  ;;  %287 = vst [vmem:[#allocation8 + $0x88] sm:$0xff] %v207_v52 }
  0x50   :  { %288 = vst [vmem:[#allocation8 + $0x90] sm:$0xff] %v208_v54  ;;  %289 = vst [vmem:[#allocation8 + $0x98] sm:$0xff] %v209_v55 }
  0x51   :  { %392 = shalt.err (!%p389_p0)
}
  0x52   :  { %s393_s27 = scalar_lea.hbm %s505_s3, 2560 }
  0x53   :  { %p394_p1 = scmp.ne.s32.totalorder %s505_s3, %s393_s27  ;;  %p397_p2 = scmp.lt.u32.totalorder %s393_s27, %s505_s3 }
  0x55   :  { %p399_p3 = pnand %p397_p2, %p394_p1 }
  0x57   :  { %402 = shalt.err (!%p399_p3)
}
  0x58   :  { %301 = dma.vmem_to_hbm [thread:$0]  %s296_s21, 2560, %s505_s3, [#allocation4], %s411_s24, %s411_s24, %s412_s25  }
  0x59   :  { %407 = dma.done.wait [#allocation4], 2560  }
  0x5a   :  { %408 = vsyncadd [#allocation4], 4294964736 }
  0x5b   :  { %305 = vsyncpa [#allocation3], 1 }
  0x5c   :  { %306 = vsyncpa [#allocation6], 1 }
  0x5d   :  { %307 = vsyncpa [#allocation4], 1 }

</bundles_post_ra>
